<compile_context>
chip_gen: v7x
topology: tpu7x:2x2x1
jax: 0.10.0
libtpu: 0.0.40
codegen_flags: <defaults>
</compile_context>

<pallas_src>
import functools

import jax
import jax.numpy as jnp
from jax.experimental import pallas as pl
from jax.experimental.pallas import tpu as pltpu


def _round_up(x, m):
    return ((x + m - 1) // m) * m


def _compl_mul_kernel(xr_ref, xi_ref, wr_ref, wi_ref, or_ref, oi_ref, *, cin):
    """Per-mode complex channel mixing, accumulated over Cin.

    xr/xi : (tile_b, Cin_p, tile_s)
    wr/wi : (Cin_p, Cout_p, tile_s)
    or/oi : (tile_b, Cout_p, tile_s)

    Only the first `cin` input channels hold real data; padded channels are
    never read.  Padded output channels carry zero weights -> zero outputs.
    """
    acc_r = None
    acc_i = None
    for i in range(cin):
        xr_i = xr_ref[:, i:i + 1, :]      # (tile_b, 1, tile_s)
        xi_i = xi_ref[:, i:i + 1, :]
        wr_i = wr_ref[i:i + 1, :, :]      # (1, Cout_p, tile_s)
        wi_i = wi_ref[i:i + 1, :, :]

        # Gauss / 3-multiply complex product for (a+bi)(c+di):
        #   k1 = c*(a+b), k2 = a*(d-c), k3 = b*(c+d)
        #   real = k1 - k3, imag = k1 + k2
        x_sum = xr_i + xi_i               # small: (tile_b, 1, tile_s)
        w_dif = wi_i - wr_i               # small: (1, Cout_p, tile_s)
        w_sum = wr_i + wi_i

        k1 = wr_i * x_sum                 # (tile_b, Cout_p, tile_s)
        k2 = xr_i * w_dif
        k3 = xi_i * w_sum

        r = k1 - k3
        im = k1 + k2
        if acc_r is None:
            acc_r, acc_i = r, im
        else:
            acc_r = acc_r + r
            acc_i = acc_i + im

    or_ref[...] = acc_r
    oi_ref[...] = acc_i


@functools.partial(jax.jit, static_argnames=("cin", "tile_s", "tile_b"))
def _spectral_mul_pallas(xr, xi, wr, wi, *, cin, tile_s, tile_b):
    """Complex per-mode channel mixing on TPU via Pallas.

    xr, xi : (Bp, Cin_p, Sp) float32  (Cin_p % 8 == 0, Sp % tile_s == 0,
                                       Bp % tile_b == 0)
    wr, wi : (Cin_p, Cout_p, Sp) float32  (Cout_p % 8 == 0)
    returns (out_r, out_i) : (Bp, Cout_p, Sp) float32
    """
    Bp, Cin_p, Sp = xr.shape
    Cout_p = wr.shape[1]

    # S outermost ("parallel", shardable across TCs); B innermost so the weight
    # block index is constant across consecutive steps -> weights resident.
    grid = (Sp // tile_s, Bp // tile_b)

    x_spec = pl.BlockSpec((tile_b, Cin_p, tile_s), lambda s, b: (b, 0, s))
    w_spec = pl.BlockSpec((Cin_p, Cout_p, tile_s), lambda s, b: (0, 0, s))
    o_spec = pl.BlockSpec((tile_b, Cout_p, tile_s), lambda s, b: (b, 0, s))

    # Per-step VMEM footprint (double-buffered blocks) + accumulators + slack.
    blk_bytes = 4 * tile_s * (2 * tile_b * Cin_p        # x (re + im)
                              + 2 * Cin_p * Cout_p      # w (re + im)
                              + 2 * tile_b * Cout_p)    # out (re + im)
    acc_bytes = 4 * tile_s * 2 * tile_b * Cout_p
    vmem_limit = int(min(max(2 * blk_bytes + acc_bytes + (4 << 20), 32 << 20),
                         64 << 20))

    flops = 8 * Bp * cin * Cout_p * Sp      # 4 mul + 4 add per (b, i, o, s)
    bytes_accessed = 4 * 2 * Sp * (Bp * Cin_p + Cin_p * Cout_p + Bp * Cout_p)

    kernel = functools.partial(_compl_mul_kernel, cin=cin)

    out_r, out_i = pl.pallas_call(
        kernel,
        out_shape=(
            jax.ShapeDtypeStruct((Bp, Cout_p, Sp), jnp.float32),
            jax.ShapeDtypeStruct((Bp, Cout_p, Sp), jnp.float32),
        ),
        grid=grid,
        in_specs=[x_spec, x_spec, w_spec, w_spec],
        out_specs=(o_spec, o_spec),
        compiler_params=pltpu.CompilerParams(
            dimension_semantics=("parallel", "arbitrary"),
            vmem_limit_bytes=vmem_limit,
        ),
        cost_estimate=pl.CostEstimate(
            flops=flops, transcendentals=0, bytes_accessed=bytes_accessed),
    )(xr, xi, wr, wi)
    return out_r, out_i


class SpectralConv3dPallas:
    """JAX/Pallas port of the PyTorch SpectralConv3d module."""

    def __init__(self, in_channels, out_channels, modes1, modes2, modes3, key,
                 tile_s=512):
        self.in_channels = in_channels
        self.out_channels = out_channels
        self.modes1 = modes1
        self.modes2 = modes2
        self.modes3 = modes3
        scale = 1.0 / (in_channels * out_channels)
        shape = (in_channels, out_channels, modes1, modes2, modes3)
        keys = jax.random.split(key, 8)
        # torch.rand(..., dtype=cfloat): real and imag each uniform [0,1); scaled.
        wr_list, wi_list = [], []
        for k in range(4):
            wr_list.append(
                scale * jax.random.uniform(keys[2 * k], shape, dtype=jnp.float32))
            wi_list.append(
                scale * jax.random.uniform(keys[2 * k + 1], shape, dtype=jnp.float32))
        # Logical (unpadded) weights: (Cin, Cout, 4, m1, m2, m3).
        self.wr = jnp.stack(wr_list, axis=2)
        self.wi = jnp.stack(wi_list, axis=2)

        # Flattened + padded kernel weights (done ONCE here, not per call).
        S = 4 * modes1 * modes2 * modes3
        self.S = S
        self.tile_s = min(tile_s, _round_up(S, 128))
        self.Sp = _round_up(S, self.tile_s)
        self.cin_p = _round_up(in_channels, 8)
        self.cout_p = _round_up(out_channels, 8)
        wr_flat = self.wr.reshape(in_channels, out_channels, S)
        wi_flat = self.wi.reshape(in_channels, out_channels, S)
        pad = ((0, self.cin_p - in_channels),
               (0, self.cout_p - out_channels),
               (0, self.Sp - S))
        self.wr_pad = jnp.pad(wr_flat, pad)   # (Cin_p, Cout_p, Sp)
        self.wi_pad = jnp.pad(wi_flat, pad)

    def __call__(self, x):
        # x: (B, Cin, D1, D2, D3) float32
        B, Ci, D1, D2, D3 = x.shape
        m1, m2, m3 = self.modes1, self.modes2, self.modes3
        Co = self.out_channels
        S, Sp = self.S, self.Sp

        # TODO(synk): FFT stays in plain JAX (no Pallas TPU FFT primitive).
        x_ft = jnp.fft.rfftn(x, axes=(-3, -2, -1))   # (B, Ci, D1, D2, D3//2+1)

        # 4 low-frequency corners, same order as weights1..4 in the torch code.
        c1 = x_ft[:, :, :m1, :m2, :m3]
        c2 = x_ft[:, :, D1 - m1:, :m2, :m3]
        c3 = x_ft[:, :, :m1, D2 - m2:, :m3]
        c4 = x_ft[:, :, D1 - m1:, D2 - m2:, :m3]
        corners = jnp.stack([c1, c2, c3, c4], axis=2)       # (B, Ci, 4, m1, m2, m3)
        x_flat = corners.reshape(B, Ci, S)
        xr = jnp.real(x_flat).astype(jnp.float32)
        xi = jnp.imag(x_flat).astype(jnp.float32)

        # Pad activations only: channels -> multiple of 8, modes -> Sp.
        if self.cin_p != Ci or Sp != S:
            pad = ((0, 0), (0, self.cin_p - Ci), (0, Sp - S))
            xr = jnp.pad(xr, pad)
            xi = jnp.pad(xi, pad)

        # Batch tile: largest divisor of B that is <= 8 (no batch padding).
        tile_b = max(d for d in range(1, min(B, 8) + 1) if B % d == 0)

        out_r, out_i = _spectral_mul_pallas(
            xr, xi, self.wr_pad, self.wi_pad,
            cin=Ci, tile_s=self.tile_s, tile_b=tile_b)

        out_r = out_r[:, :Co, :S]
        out_i = out_i[:, :Co, :S]
        out_c = (out_r + 1j * out_i).astype(jnp.complex64)   # (B, Co, S)
        out_c = out_c.reshape(B, Co, 4, m1, m2, m3)
        o1, o2, o3, o4 = (out_c[:, :, k] for k in range(4))

        out_ft = jnp.zeros((B, Co, D1, D2, D3 // 2 + 1), dtype=jnp.complex64)
        out_ft = out_ft.at[:, :, :m1, :m2, :m3].set(o1)
        out_ft = out_ft.at[:, :, D1 - m1:, :m2, :m3].set(o2)
        out_ft = out_ft.at[:, :, :m1, D2 - m2:, :m3].set(o3)
        out_ft = out_ft.at[:, :, D1 - m1:, D2 - m2:, :m3].set(o4)

        y = jnp.fft.irfftn(out_ft, s=(D1, D2, D3), axes=(-3, -2, -1))
        return y.astype(jnp.float32)


def _reference_forward(module, x):
    """Pure-JAX reference (complex einsum) for correctness check."""
    B, Ci, D1, D2, D3 = x.shape
    m1, m2, m3 = module.modes1, module.modes2, module.modes3
    Co = module.out_channels
    w = (module.wr + 1j * module.wi).astype(jnp.complex64)  # (Ci, Co, 4, m1, m2, m3)
    x_ft = jnp.fft.rfftn(x, axes=(-3, -2, -1))
    c1 = x_ft[:, :, :m1, :m2, :m3]
    c2 = x_ft[:, :, D1 - m1:, :m2, :m3]
    c3 = x_ft[:, :, :m1, D2 - m2:, :m3]
    c4 = x_ft[:, :, D1 - m1:, D2 - m2:, :m3]
    out_ft = jnp.zeros((B, Co, D1, D2, D3 // 2 + 1), dtype=jnp.complex64)
    mul = lambda inp, ww: jnp.einsum("bixyz,ioxyz->boxyz", inp, ww)
    out_ft = out_ft.at[:, :, :m1, :m2, :m3].set(mul(c1, w[:, :, 0]))
    out_ft = out_ft.at[:, :, D1 - m1:, :m2, :m3].set(mul(c2, w[:, :, 1]))
    out_ft = out_ft.at[:, :, :m1, D2 - m2:, :m3].set(mul(c3, w[:, :, 2]))
    out_ft = out_ft.at[:, :, D1 - m1:, D2 - m2:, :m3].set(mul(c4, w[:, :, 3]))
    return jnp.fft.irfftn(out_ft, s=(D1, D2, D3), axes=(-3, -2, -1)).astype(jnp.float32)


if __name__ == "__main__":
    key = jax.random.PRNGKey(0)
    k_x, k_w = jax.random.split(key)

    B, Cin, Cout = 2, 4, 4
    D1 = D2 = D3 = 16
    m1 = m2 = m3 = 4

    module = SpectralConv3dPallas(Cin, Cout, m1, m2, m3, k_w)
    x = jax.random.normal(k_x, (B, Cin, D1, D2, D3), dtype=jnp.float32)

    y = module(x)
    y = jax.block_until_ready(y)

    y_ref = jax.block_until_ready(_reference_forward(module, x))
    assert y.shape == (B, Cout, D1, D2, D3), y.shape
    max_err = float(jnp.max(jnp.abs(y - y_ref)))
    assert max_err < 1e-4, max_err

    print("KERNEL_OK")
</pallas_src>

<mosaic_0001>
module attributes {stable_mosaic.version = 11 : i64} {
  func.func @_compl_mul_kernel(%arg0: i32, %arg1: i32, %arg2: memref<2x8x256xf32, #tpu.memory_space<vmem>>, %arg3: memref<2x8x256xf32, #tpu.memory_space<vmem>>, %arg4: memref<8x8x256xf32, #tpu.memory_space<vmem>>, %arg5: memref<8x8x256xf32, #tpu.memory_space<vmem>>, %arg6: memref<2x8x256xf32, #tpu.memory_space<vmem>>, %arg7: memref<2x8x256xf32, #tpu.memory_space<vmem>>) attributes {dimension_semantics = [#tpu.dimension_semantics<parallel>, #tpu.dimension_semantics<arbitrary>], iteration_bounds = array<i64: 1, 1>, scalar_prefetch = 0 : i64, scratch_operands = 0 : i64, tpu.core_type = #tpu.core_type<tc>, window_params = [{transform_indices = @transform_0, window_bounds = array<i64: 2, 8, 256>}, {transform_indices = @transform_1, window_bounds = array<i64: 2, 8, 256>}, {transform_indices = @transform_2, window_bounds = array<i64: 8, 8, 256>}, {transform_indices = @transform_3, window_bounds = array<i64: 8, 8, 256>}, {transform_indices = @transform_4, window_bounds = array<i64: 2, 8, 256>}, {transform_indices = @transform_5, window_bounds = array<i64: 2, 8, 256>}]} {
    %c0 = arith.constant 0 : index
    %c0_0 = arith.constant 0 : index
    %c0_1 = arith.constant 0 : index
    %0 = vector.load %arg2[%c0, %c0_0, %c0_1] : memref<2x8x256xf32, #tpu.memory_space<vmem>>, vector<2x1x256xf32>
    %c0_2 = arith.constant 0 : index
    %c0_3 = arith.constant 0 : index
    %c0_4 = arith.constant 0 : index
    %1 = vector.load %arg3[%c0_2, %c0_3, %c0_4] : memref<2x8x256xf32, #tpu.memory_space<vmem>>, vector<2x1x256xf32>
    %c0_5 = arith.constant 0 : index
    %c0_6 = arith.constant 0 : index
    %c0_7 = arith.constant 0 : index
    %2 = vector.load %arg4[%c0_5, %c0_6, %c0_7] : memref<8x8x256xf32, #tpu.memory_space<vmem>>, vector<1x8x256xf32>
    %c0_8 = arith.constant 0 : index
    %c0_9 = arith.constant 0 : index
    %c0_10 = arith.constant 0 : index
    %3 = vector.load %arg5[%c0_8, %c0_9, %c0_10] : memref<8x8x256xf32, #tpu.memory_space<vmem>>, vector<1x8x256xf32>
    %4 = arith.addf %0, %1 : vector<2x1x256xf32>
    %5 = arith.subf %3, %2 : vector<1x8x256xf32>
    %6 = arith.addf %2, %3 : vector<1x8x256xf32>
    %7 = vector.broadcast %2 : vector<1x8x256xf32> to vector<2x8x256xf32>
    %8 = vector.broadcast %4 : vector<2x1x256xf32> to vector<2x8x256xf32>
    %9 = arith.mulf %7, %8 : vector<2x8x256xf32>
    %10 = vector.broadcast %0 : vector<2x1x256xf32> to vector<2x8x256xf32>
    %11 = vector.broadcast %5 : vector<1x8x256xf32> to vector<2x8x256xf32>
    %12 = arith.mulf %10, %11 : vector<2x8x256xf32>
    %13 = vector.broadcast %1 : vector<2x1x256xf32> to vector<2x8x256xf32>
    %14 = vector.broadcast %6 : vector<1x8x256xf32> to vector<2x8x256xf32>
    %15 = arith.mulf %13, %14 : vector<2x8x256xf32>
    %16 = arith.subf %9, %15 : vector<2x8x256xf32>
    %17 = arith.addf %9, %12 : vector<2x8x256xf32>
    %c0_11 = arith.constant 0 : index
    %c1 = arith.constant 1 : index
    %c0_12 = arith.constant 0 : index
    %18 = vector.load %arg2[%c0_11, %c1, %c0_12] : memref<2x8x256xf32, #tpu.memory_space<vmem>>, vector<2x1x256xf32>
    %c0_13 = arith.constant 0 : index
    %c1_14 = arith.constant 1 : index
    %c0_15 = arith.constant 0 : index
    %19 = vector.load %arg3[%c0_13, %c1_14, %c0_15] : memref<2x8x256xf32, #tpu.memory_space<vmem>>, vector<2x1x256xf32>
    %c1_16 = arith.constant 1 : index
    %c0_17 = arith.constant 0 : index
    %c0_18 = arith.constant 0 : index
    %20 = vector.load %arg4[%c1_16, %c0_17, %c0_18] : memref<8x8x256xf32, #tpu.memory_space<vmem>>, vector<1x8x256xf32>
    %c1_19 = arith.constant 1 : index
    %c0_20 = arith.constant 0 : index
    %c0_21 = arith.constant 0 : index
    %21 = vector.load %arg5[%c1_19, %c0_20, %c0_21] : memref<8x8x256xf32, #tpu.memory_space<vmem>>, vector<1x8x256xf32>
    %22 = arith.addf %18, %19 : vector<2x1x256xf32>
    %23 = arith.subf %21, %20 : vector<1x8x256xf32>
    %24 = arith.addf %20, %21 : vector<1x8x256xf32>
    %25 = vector.broadcast %20 : vector<1x8x256xf32> to vector<2x8x256xf32>
    %26 = vector.broadcast %22 : vector<2x1x256xf32> to vector<2x8x256xf32>
    %27 = arith.mulf %25, %26 : vector<2x8x256xf32>
    %28 = vector.broadcast %18 : vector<2x1x256xf32> to vector<2x8x256xf32>
    %29 = vector.broadcast %23 : vector<1x8x256xf32> to vector<2x8x256xf32>
    %30 = arith.mulf %28, %29 : vector<2x8x256xf32>
    %31 = vector.broadcast %19 : vector<2x1x256xf32> to vector<2x8x256xf32>
    %32 = vector.broadcast %24 : vector<1x8x256xf32> to vector<2x8x256xf32>
    %33 = arith.mulf %31, %32 : vector<2x8x256xf32>
    %34 = arith.subf %27, %33 : vector<2x8x256xf32>
    %35 = arith.addf %27, %30 : vector<2x8x256xf32>
    %36 = arith.addf %16, %34 : vector<2x8x256xf32>
    %37 = arith.addf %17, %35 : vector<2x8x256xf32>
    %c0_22 = arith.constant 0 : index
    %c2 = arith.constant 2 : index
    %c0_23 = arith.constant 0 : index
    %38 = vector.load %arg2[%c0_22, %c2, %c0_23] : memref<2x8x256xf32, #tpu.memory_space<vmem>>, vector<2x1x256xf32>
    %c0_24 = arith.constant 0 : index
    %c2_25 = arith.constant 2 : index
    %c0_26 = arith.constant 0 : index
    %39 = vector.load %arg3[%c0_24, %c2_25, %c0_26] : memref<2x8x256xf32, #tpu.memory_space<vmem>>, vector<2x1x256xf32>
    %c2_27 = arith.constant 2 : index
    %c0_28 = arith.constant 0 : index
    %c0_29 = arith.constant 0 : index
    %40 = vector.load %arg4[%c2_27, %c0_28, %c0_29] : memref<8x8x256xf32, #tpu.memory_space<vmem>>, vector<1x8x256xf32>
    %c2_30 = arith.constant 2 : index
    %c0_31 = arith.constant 0 : index
    %c0_32 = arith.constant 0 : index
    %41 = vector.load %arg5[%c2_30, %c0_31, %c0_32] : memref<8x8x256xf32, #tpu.memory_space<vmem>>, vector<1x8x256xf32>
    %42 = arith.addf %38, %39 : vector<2x1x256xf32>
    %43 = arith.subf %41, %40 : vector<1x8x256xf32>
    %44 = arith.addf %40, %41 : vector<1x8x256xf32>
    %45 = vector.broadcast %40 : vector<1x8x256xf32> to vector<2x8x256xf32>
    %46 = vector.broadcast %42 : vector<2x1x256xf32> to vector<2x8x256xf32>
    %47 = arith.mulf %45, %46 : vector<2x8x256xf32>
    %48 = vector.broadcast %38 : vector<2x1x256xf32> to vector<2x8x256xf32>
    %49 = vector.broadcast %43 : vector<1x8x256xf32> to vector<2x8x256xf32>
    %50 = arith.mulf %48, %49 : vector<2x8x256xf32>
    %51 = vector.broadcast %39 : vector<2x1x256xf32> to vector<2x8x256xf32>
    %52 = vector.broadcast %44 : vector<1x8x256xf32> to vector<2x8x256xf32>
    %53 = arith.mulf %51, %52 : vector<2x8x256xf32>
    %54 = arith.subf %47, %53 : vector<2x8x256xf32>
    %55 = arith.addf %47, %50 : vector<2x8x256xf32>
    %56 = arith.addf %36, %54 : vector<2x8x256xf32>
    %57 = arith.addf %37, %55 : vector<2x8x256xf32>
    %c0_33 = arith.constant 0 : index
    %c3 = arith.constant 3 : index
    %c0_34 = arith.constant 0 : index
    %58 = vector.load %arg2[%c0_33, %c3, %c0_34] : memref<2x8x256xf32, #tpu.memory_space<vmem>>, vector<2x1x256xf32>
    %c0_35 = arith.constant 0 : index
    %c3_36 = arith.constant 3 : index
    %c0_37 = arith.constant 0 : index
    %59 = vector.load %arg3[%c0_35, %c3_36, %c0_37] : memref<2x8x256xf32, #tpu.memory_space<vmem>>, vector<2x1x256xf32>
    %c3_38 = arith.constant 3 : index
    %c0_39 = arith.constant 0 : index
    %c0_40 = arith.constant 0 : index
    %60 = vector.load %arg4[%c3_38, %c0_39, %c0_40] : memref<8x8x256xf32, #tpu.memory_space<vmem>>, vector<1x8x256xf32>
    %c3_41 = arith.constant 3 : index
    %c0_42 = arith.constant 0 : index
    %c0_43 = arith.constant 0 : index
    %61 = vector.load %arg5[%c3_41, %c0_42, %c0_43] : memref<8x8x256xf32, #tpu.memory_space<vmem>>, vector<1x8x256xf32>
    %62 = arith.addf %58, %59 : vector<2x1x256xf32>
    %63 = arith.subf %61, %60 : vector<1x8x256xf32>
    %64 = arith.addf %60, %61 : vector<1x8x256xf32>
    %65 = vector.broadcast %60 : vector<1x8x256xf32> to vector<2x8x256xf32>
    %66 = vector.broadcast %62 : vector<2x1x256xf32> to vector<2x8x256xf32>
    %67 = arith.mulf %65, %66 : vector<2x8x256xf32>
    %68 = vector.broadcast %58 : vector<2x1x256xf32> to vector<2x8x256xf32>
    %69 = vector.broadcast %63 : vector<1x8x256xf32> to vector<2x8x256xf32>
    %70 = arith.mulf %68, %69 : vector<2x8x256xf32>
    %71 = vector.broadcast %59 : vector<2x1x256xf32> to vector<2x8x256xf32>
    %72 = vector.broadcast %64 : vector<1x8x256xf32> to vector<2x8x256xf32>
    %73 = arith.mulf %71, %72 : vector<2x8x256xf32>
    %74 = arith.subf %67, %73 : vector<2x8x256xf32>
    %75 = arith.addf %67, %70 : vector<2x8x256xf32>
    %76 = arith.addf %56, %74 : vector<2x8x256xf32>
    %77 = arith.addf %57, %75 : vector<2x8x256xf32>
    %c0_44 = arith.constant 0 : index
    %c0_45 = arith.constant 0 : index
    %c0_46 = arith.constant 0 : index
    %78 = vector.load %arg6[%c0_44, %c0_45, %c0_46] : memref<2x8x256xf32, #tpu.memory_space<vmem>>, vector<2x8x256xf32>
    tpu.vector_store %arg6[%c0_44, %c0_45, %c0_46], %76 {strides = array<i32>} : memref<2x8x256xf32, #tpu.memory_space<vmem>>, vector<2x8x256xf32>,
    %c0_47 = arith.constant 0 : index
    %c0_48 = arith.constant 0 : index
    %c0_49 = arith.constant 0 : index
    %79 = vector.load %arg7[%c0_47, %c0_48, %c0_49] : memref<2x8x256xf32, #tpu.memory_space<vmem>>, vector<2x8x256xf32>
    tpu.vector_store %arg7[%c0_47, %c0_48, %c0_49], %77 {strides = array<i32>} : memref<2x8x256xf32, #tpu.memory_space<vmem>>, vector<2x8x256xf32>,
    return
  }
  func.func @transform_0(%arg0: i32, %arg1: i32) -> (i32, i32, i32) {
    %c0_i32 = arith.constant 0 : i32
    %c0_i32_0 = arith.constant 0 : i32
    return %arg1, %c0_i32, %arg0 : i32, i32, i32
  }
  func.func @transform_1(%arg0: i32, %arg1: i32) -> (i32, i32, i32) {
    %c0_i32 = arith.constant 0 : i32
    %c0_i32_0 = arith.constant 0 : i32
    return %arg1, %c0_i32, %arg0 : i32, i32, i32
  }
  func.func @transform_2(%arg0: i32, %arg1: i32) -> (i32, i32, i32) {
    %c0_i32 = arith.constant 0 : i32
    %c0_i32_0 = arith.constant 0 : i32
    %c0_i32_1 = arith.constant 0 : i32
    return %c0_i32, %c0_i32_0, %arg0 : i32, i32, i32
  }
  func.func @transform_3(%arg0: i32, %arg1: i32) -> (i32, i32, i32) {
    %c0_i32 = arith.constant 0 : i32
    %c0_i32_0 = arith.constant 0 : i32
    %c0_i32_1 = arith.constant 0 : i32
    return %c0_i32, %c0_i32_0, %arg0 : i32, i32, i32
  }
  func.func @transform_4(%arg0: i32, %arg1: i32) -> (i32, i32, i32) {
    %c0_i32 = arith.constant 0 : i32
    %c0_i32_0 = arith.constant 0 : i32
    return %arg1, %c0_i32, %arg0 : i32, i32, i32
  }
  func.func @transform_5(%arg0: i32, %arg1: i32) -> (i32, i32, i32) {
    %c0_i32 = arith.constant 0 : i32
    %c0_i32_0 = arith.constant 0 : i32
    return %arg1, %c0_i32, %arg0 : i32, i32, i32
  }
}

</mosaic_0001>

<bundles_post_ra>
// kernel: _spectral_mul_pallas.1
= control target key start
LH: loop header
LB: loop body
LE: loop exit
PB: predicated region body
PF: predicated region fallthrough
CT: control target
= control target key end

     0   :  { %11 = vsyncpa [#allocation3], 0  ;;  %s1139_s0 = inlined_call_operand.hbm [shape: f32[2,8,256], index: 0, kind: input, shape index: {}]   ;;  %s1140_s1 = inlined_call_operand.hbm [shape: f32[2,8,256], index: 1, kind: input, shape index: {}]   ;;  %s1141_s2 = inlined_call_operand.hbm [shape: f32[8,8,256], index: 2, kind: input, shape index: {}]   ;;  %s1142_s3 = inlined_call_operand.hbm [shape: f32[8,8,256], index: 3, kind: input, shape index: {}]   ;;  %s1143_s4 = inlined_call_operand.hbm [shape: f32[2,8,256], index: 4, kind: output, shape index: {0}]   ;;  %s1144_s5 = inlined_call_operand.hbm [shape: f32[2,8,256], index: 5, kind: output, shape index: {1}]  }
   0x1   :  { %12 = vsyncpa [#allocation6], 0 }
   0x2   :  { %13 = vsyncpa [#allocation9], 0 }
   0x3   :  { %14 = vsyncpa [#allocation4], 0 }
   0x4   :  { %15 = vsyncpa [#allocation12], 0  ;;  %s713_s18 = smov [#allocation5]   ;;  %s714_s20 = smov [#allocation2]  }
   0x5   :  { %s33_s19 = sshll.u32 %s713_s18, 4  ;;  %s21_s21 = sshll.u32 %s714_s20, 4  ;;  %s34_s19 = int_to_ptr.vmem [resolvable:$true] %s33_s19  ;;  %s751_s21 = int_to_ptr.vmem [resolvable:$true] %s21_s21 }
   0x6   :  { %s571_s24 = scalar_lea.hbm %s1140_s1, 512 }
   0x7   :  { %p572_p0 = scmp.ne.s32.totalorder %s1140_s1, %s571_s24  ;;  %p575_p1 = scmp.lt.u32.totalorder %s571_s24, %s1140_s1 }
   0x9   :  { %p577_p2 = pnand %p575_p1, %p572_p0 }
   0xb   :  { %580 = shalt.err (!%p577_p2)
}
   0xc   :  { %s581_s29 = scalar_lea.vmem %s34_s19, 512  ;;  %p586_p4 = scmp.lt.s32.totalorder %s34_s19, %s34_s19 }
   0xd   :  { %p582_p3 = scmp.ne.s32.totalorder %s34_s19, %s581_s29  ;;  %p587_p5 = scmp.lt.s32.totalorder %s581_s29, %s581_s29 }
   0xf   :  { %p588_p6 = por %p587_p5, %p586_p4 }
  0x11   :  { %p589_p7 = pnand %p588_p6, %p582_p3 }
  0x13   :  { %592 = shalt.err (!%p589_p7)
}
  0x14   :  { %s715_s30 = smov 256   ;;  %s716_s6 = smov 16  }
  0x15   :  { %39 = dma.hbm_to_vmem [thread:$0]  %s1140_s1, 512, %s34_s19, [#allocation6], %s715_s30, %s715_s30, %s716_s6  }
  0x16   :  { %s593_s11 = scalar_lea.hbm %s1139_s0, 512 }
  0x17   :  { %p594_p8 = scmp.ne.s32.totalorder %s1139_s0, %s593_s11  ;;  %p597_p9 = scmp.lt.u32.totalorder %s593_s11, %s1139_s0 }
  0x19   :  { %p599_p10 = pnand %p597_p9, %p594_p8 }
  0x1b   :  { %602 = shalt.err (!%p599_p10)
}
  0x1c   :  { %s603_s16 = scalar_lea.vmem %s751_s21, 512  ;;  %p608_p12 = scmp.lt.s32.totalorder %s751_s21, %s751_s21 }
  0x1d   :  { %p604_p11 = scmp.ne.s32.totalorder %s751_s21, %s603_s16  ;;  %p609_p13 = scmp.lt.s32.totalorder %s603_s16, %s603_s16 }
  0x1f   :  { %p610_p0 = por %p609_p13, %p608_p12 }
  0x21   :  { %p611_p1 = pnand %p610_p0, %p604_p11 }
  0x23   :  { %614 = shalt.err (!%p611_p1)
}
  0x24   :  { %27 = dma.hbm_to_vmem [thread:$0]  %s1139_s0, 512, %s751_s21, [#allocation3], %s715_s30, %s715_s30, %s716_s6  }
  0x25   :  { %s717_s18 = smov [#allocation7]   ;;  %s718_s20 = smov [#allocation8]  }
  0x26   :  { %s45_s19 = sshll.u32 %s717_s18, 4  ;;  %s57_s22 = sshll.u32 %s718_s20, 4  ;;  %s46_s19 = int_to_ptr.vmem [resolvable:$true] %s45_s19  ;;  %s788_s22 = int_to_ptr.vmem [resolvable:$true] %s57_s22 }
  0x27   :  { %s615_s25 = scalar_lea.hbm %s1141_s2, 2048 }
  0x28   :  { %p616_p2 = scmp.ne.s32.totalorder %s1141_s2, %s615_s25  ;;  %p619_p3 = scmp.lt.u32.totalorder %s615_s25, %s1141_s2 }
  0x2a   :  { %p621_p4 = pnand %p619_p3, %p616_p2 }
  0x2c   :  { %624 = shalt.err (!%p621_p4)
}
  0x2d   :  { %s625_s0 = scalar_lea.vmem %s46_s19, 2048  ;;  %p630_p6 = scmp.lt.s32.totalorder %s46_s19, %s46_s19 }
  0x2e   :  { %p626_p5 = scmp.ne.s32.totalorder %s46_s19, %s625_s0  ;;  %p631_p7 = scmp.lt.s32.totalorder %s625_s0, %s625_s0 }
  0x30   :  { %p632_p8 = por %p631_p7, %p630_p6 }
  0x32   :  { %p633_p9 = pnand %p632_p8, %p626_p5 }
  0x34   :  { %636 = shalt.err (!%p633_p9)
}
  0x35   :  { %51 = dma.hbm_to_vmem [thread:$0]  %s1141_s2, 2048, %s46_s19, [#allocation6], %s715_s30, %s715_s30, %s716_s6  }
  0x36   :  { %s637_s10 = scalar_lea.hbm %s1142_s3, 2048 }
  0x37   :  { %p638_p10 = scmp.ne.s32.totalorder %s1142_s3, %s637_s10  ;;  %p641_p11 = scmp.lt.u32.totalorder %s637_s10, %s1142_s3 }
  0x39   :  { %p643_p12 = pnand %p641_p11, %p638_p10 }
  0x3b   :  { %646 = shalt.err (!%p643_p12)
}
  0x3c   :  { %s647_s15 = scalar_lea.vmem %s788_s22, 2048  ;;  %p652_p0 = scmp.lt.s32.totalorder %s788_s22, %s788_s22 }
  0x3d   :  { %p648_p13 = scmp.ne.s32.totalorder %s788_s22, %s647_s15  ;;  %p653_p1 = scmp.lt.s32.totalorder %s647_s15, %s647_s15 }
  0x3f   :  { %p654_p2 = por %p653_p1, %p652_p0 }
  0x41   :  { %p655_p3 = pnand %p654_p2, %p648_p13 }
  0x43   :  { %658 = shalt.err (!%p655_p3)
}
  0x44   :  { %63 = dma.hbm_to_vmem [thread:$0]  %s1142_s3, 2048, %s788_s22, [#allocation9], %s715_s30, %s715_s30, %s716_s6  }
  0x45   :  { %703 = dma.done.wait [#allocation3], 512  }
  0x46   :  { %704 = vsyncadd [#allocation3], 4294966784 }
  0x47   :  { %705 = dma.done.wait [#allocation6], 2560  }
  0x48   :  { %706 = vsyncadd [#allocation6], 4294964736 }
  0x49   :  { %707 = dma.done.wait [#allocation9], 2048  }
  0x4a   :  { %708 = vsyncadd [#allocation9], 4294965248  ;;  %v94_v0 = vlaneseq  ;;  %v829_v4 = vld [vmem:[#allocation2] ss:$8 sm:$0x3]  ;;  %v843_v15 = vld [vmem:[#allocation7 + $0x10] sm:$0xff] }
  0x4b   :  { %v79_v5 = vld [vmem:[#allocation5] ss:$8 sm:$0x3]  ;;  %v835_v10 = vld [vmem:[#allocation2 + $0x1] ss:$8 sm:$0x3] }
  0x4c   :  { %v95_v1 = vshrl.u32 %v94_v0, 7  ;;  %v831_v6 = vld [vmem:[#allocation7] sm:$0xff]  ;;  %v86_v8 = vadd.f32 %v79_v5, %v829_v4  ;;  %v845_v16 = vld [vmem:[#allocation8 + $0x10] sm:$0xff]  ;;  %v893_v44 = vld [vmem:[#allocation7 + $0x8] sm:$0xff]  ;;  %s719_s3 = smov [#allocation10]  }
  0x4d   :  { %v84_v7 = vld [vmem:[#allocation8] sm:$0xff]  ;;  %v858_v22 = vadd.f32 %v845_v16, %v843_v15  ;;  %v882_v38 = vld [vmem:[#allocation7 + $0x30] sm:$0xff]  ;;  %v895_v45 = vld [vmem:[#allocation8 + $0x8] sm:$0xff]  ;;  %s533_s1 = sshll.u32 %s719_s3, 4  ;;  %s1068_s1 = int_to_ptr.vmem [resolvable:$true] %s533_s1 }
  0x4e   :  { %v825_v2 = vsub.s32 0, %v95_v1  ;;  %v827_v3 = vsub.s32 1, %v95_v1  ;;  %v841_v13 = vadd.f32 %v84_v7, %v831_v6  ;;  %v183_v14 = vld [vmem:[#allocation5 + $0x1] ss:$8 sm:$0x3]  ;;  %v848_v17 = vsub.f32 %v84_v7, %v831_v6  ;;  %v884_v39 = vld [vmem:[#allocation8 + $0x30] sm:$0xff]  ;;  %p664_p5 = scmp.lt.s32.totalorder %s1068_s1, %s1068_s1 }
  0x4f   :  { %v192_v21 = vadd.f32 %v183_v14, %v835_v10  ;;  %v861_v24 = vld [vmem:[#allocation2 + $0x2] ss:$8 sm:$0x3]  ;;  %v870_v31 = vld [vmem:[#allocation2 + $0x3] ss:$8 sm:$0x3]  ;;  %v890_v42 = vadd.f32 %v884_v39, %v882_v38  ;;  %v906_v50 = vadd.f32 %v895_v45, %v893_v44 }
  0x50   :  { %v149_v9 = vrot.slane %v79_v5, %v825_v2  ;;  %v153_v11 = vrot.slane %v79_v5, %v827_v3  ;;  %v97_v20 = vrot.slane %v86_v8, %v825_v2  ;;  %v255_v23 = vrot.slane %v183_v14, %v825_v2  ;;  %v297_v25 = vld [vmem:[#allocation5 + $0x2] ss:$8 sm:$0x3]  ;;  %v411_v37 = vld [vmem:[#allocation5 + $0x3] ss:$8 sm:$0x3] }
  0x51   :  { %v864_v27 = vld [vmem:[#allocation7 + $0x20] sm:$0xff]  ;;  %v306_v29 = vadd.f32 %v297_v25, %v861_v24  ;;  %v369_v30 = vrot.slane %v297_v25, %v825_v2  ;;  %v101_v32 = vrot.slane %v86_v8, %v827_v3  ;;  %v203_v34 = vrot.slane %v192_v21, %v825_v2  ;;  %v897_v46 = vld [vmem:[#allocation7 + $0x18] sm:$0xff]  ;;  %v910_v52 = vld [vmem:[#allocation7 + $0x28] sm:$0xff]  ;;  %s659_s17 = scalar_lea.vmem %s1068_s1, 512 }
  0x52   :  { %v166_v26 = vmul.f32 %v149_v9, %v841_v13  ;;  %v866_v28 = vld [vmem:[#allocation8 + $0x20] sm:$0xff]  ;;  %v874_v33 = vmul.f32 %v97_v20, %v831_v6  ;;  %v272_v35 = vmul.f32 %v255_v23, %v858_v22  ;;  %v420_v41 = vadd.f32 %v411_v37, %v870_v31  ;;  %v908_v51 = vld [vmem:[#allocation8 + $0x18] sm:$0xff]  ;;  %v912_v53 = vld [vmem:[#allocation8 + $0x28] sm:$0xff]  ;;  %p660_p4 = scmp.ne.s32.totalorder %s1068_s1, %s659_s17  ;;  %p665_p6 = scmp.lt.s32.totalorder %s659_s17, %s659_s17 }
  0x53   :  { %v880_v36 = vadd.f32 %v866_v28, %v864_v27  ;;  %v317_v40 = vrot.slane %v306_v29, %v825_v2  ;;  %v483_v43 = vrot.slane %v411_v37, %v825_v2  ;;  %v901_v48 = vmul.f32 %v203_v34, %v843_v15  ;;  %v929_v62 = vld [vmem:[#allocation7 + $0x38] sm:$0xff] }
  0x54   :  { %v170_v47 = vsub.f32 %v874_v33, %v166_v26  ;;  %v431_v55 = vrot.slane %v420_v41, %v825_v2  ;;  %v920_v57 = vmul.f32 %v101_v32, %v893_v44  ;;  %v167_v59 = vmul.f32 %v153_v11, %v906_v50  ;;  %v931_v63 = vld [vmem:[#allocation8 + $0x38] sm:$0xff]  ;;  %p666_p7 = por %p665_p6, %p664_p5 }
  0x55   :  { %v386_v49 = vmul.f32 %v369_v30, %v880_v36  ;;  %v915_v54 = vmul.f32 %v317_v40, %v864_v27  ;;  %v500_v56 = vmul.f32 %v483_v43, %v890_v42  ;;  %v276_v58 = vsub.f32 %v901_v48, %v272_v35  ;;  %v81_v23 = vld [vmem:[#allocation5 + $0x10] ss:$8 sm:$0x3]  ;;  %v956_v34 = vld [vmem:[#allocation2 + $0x11] ss:$8 sm:$0x3] }
  0x56   :  { %v926_v60 = vadd.f32 %v908_v51, %v897_v46  ;;  %v207_v61 = vrot.slane %v192_v21, %v827_v3  ;;  %v935_v1 = vmul.f32 %v431_v55, %v882_v38  ;;  %v259_v5 = vrot.slane %v183_v14, %v827_v3  ;;  %v947_v21 = vld [vmem:[#allocation2 + $0x10] ss:$8 sm:$0x3]  ;;  %v185_v35 = vld [vmem:[#allocation5 + $0x11] ss:$8 sm:$0x3]  ;;  %p667_p8 = pnand %p666_p7, %p660_p4 }
  0x57   :  { %v390_v0 = vsub.f32 %v915_v54, %v386_v49  ;;  %v940_v7 = vadd.f32 %v912_v53, %v910_v52  ;;  %v284_v8 = vadd.f32 %v276_v58, %v170_v47  ;;  %v171_v9 = vsub.f32 %v920_v57, %v167_v59  ;;  %v967_v58 = vld [vmem:[#allocation2 + $0x12] ss:$8 sm:$0x3] }
  0x58   :  { %v944_v11 = vmul.f32 %v207_v61, %v897_v46  ;;  %v321_v20 = vrot.slane %v306_v29, %v827_v3  ;;  %v504_v26 = vsub.f32 %v935_v1, %v500_v56  ;;  %v273_v30 = vmul.f32 %v259_v5, %v926_v60  ;;  %v299_v59 = vld [vmem:[#allocation5 + $0x12] ss:$8 sm:$0x3] }
  0x59   :  { %v373_v14 = vrot.slane %v297_v25, %v827_v3  ;;  %v954_v32 = vadd.f32 %v931_v63, %v929_v62  ;;  %v398_v40 = vadd.f32 %v390_v0, %v284_v8  ;;  %v435_v29 = vrot.slane %v420_v41, %v827_v3  ;;  %v413_v8 = vld [vmem:[#allocation5 + $0x13] ss:$8 sm:$0x3] }
  0x5a   :  { %v959_v43 = vmul.f32 %v321_v20, %v910_v52  ;;  %v487_v47 = vrot.slane %v411_v37, %v827_v3  ;;  %v277_v49 = vsub.f32 %v944_v11, %v273_v30  ;;  %v87_v25 = vadd.f32 %v81_v23, %v947_v21  ;;  %v974_v37 = vld [vmem:[#allocation2 + $0x13] ss:$8 sm:$0x3] }
  0x5b   :  { %v387_v55 = vmul.f32 %v373_v14, %v940_v7  ;;  %v157_v56 = vrot.slane %v81_v23, %v825_v2  ;;  %v512_v61 = vadd.f32 %v504_v26, %v398_v40  ;;  %v970_v0 = vmul.f32 %v435_v29, %v929_v62 }
  0x5c   :  { %v501_v5 = vmul.f32 %v487_v47, %v954_v32  ;;  %v193_v41 = vadd.f32 %v185_v35, %v956_v34  ;;  %v285_v20 = vadd.f32 %v277_v49, %v171_v9  ;;  %v105_v14 = vrot.slane %v87_v25, %v825_v2 }
  0x5d   :  { %1146 = vst [vmem:[#allocation18_spill] sm:$0xff] %v970_v0  ;;  %v391_v30 = vsub.f32 %v959_v43, %v387_v55  ;;  %v168_v19 = vmul.f32 %v157_v56, %v841_v13  ;;  %520 = vst [vmem:[#allocation10] sm:$0xff] %v512_v61  ;;  %v263_v29 = vrot.slane %v185_v35, %v825_v2 }
  0x5e   :  { %v505_v26 = vsub.f32 %v970_v0, %v501_v5  ;;  %v211_v40 = vrot.slane %v193_v41, %v825_v2  ;;  %v307_v47 = vadd.f32 %v299_v59, %v967_v58  ;;  %v984_v12 = vmul.f32 %v105_v14, %v831_v6 }
  0x5f   :  { %v399_v18 = vadd.f32 %v391_v30, %v285_v20  ;;  %v377_v9 = vrot.slane %v299_v59, %v825_v2  ;;  %v421_v49 = vadd.f32 %v413_v8, %v974_v37  ;;  %v274_v13 = vmul.f32 %v263_v29, %v858_v22 }
  0x60   :  { %v989_v55 = vmul.f32 %v211_v40, %v843_v15  ;;  %v325_v56 = vrot.slane %v307_v47, %v825_v2  ;;  %v491_v61 = vrot.slane %v413_v8, %v825_v2  ;;  %v172_v0 = vsub.f32 %v984_v12, %v168_v19 }
  0x61   :  { %v513_v5 = vadd.f32 %v505_v26, %v399_v18  ;;  %v388_v20 = vmul.f32 %v377_v9, %v880_v36  ;;  %v439_v6 = vrot.slane %v421_v49, %v825_v2  ;;  %v109_v22 = vrot.slane %v87_v25, %v827_v3 }
  0x62   :  { %v278_v30 = vsub.f32 %v989_v55, %v274_v13  ;;  %v999_v14 = vmul.f32 %v325_v56, %v864_v27  ;;  %v502_v40 = vmul.f32 %v491_v61, %v890_v42  ;;  %v161_v18 = vrot.slane %v81_v23, %v827_v3 }
  0x63   :  { %521 = vst [vmem:[#allocation10 + $0x8] sm:$0xff] %v513_v5  ;;  %v1004_v29 = vmul.f32 %v439_v6, %v882_v38  ;;  %v215_v19 = vrot.slane %v193_v41, %v827_v3  ;;  %v267_v36 = vrot.slane %v185_v35, %v827_v3  ;;  %v1011_v13 = vmul.f32 %v109_v22, %v893_v44 }
  0x64   :  { %v286_v26 = vadd.f32 %v278_v30, %v172_v0  ;;  %v392_v9 = vsub.f32 %v999_v14, %v388_v20  ;;  %v329_v42 = vrot.slane %v307_v47, %v827_v3  ;;  %v169_v56 = vmul.f32 %v161_v18, %v906_v50 }
  0x65   :  { %v506_v25 = vsub.f32 %v1004_v29, %v502_v40  ;;  %v1017_v61 = vmul.f32 %v215_v19, %v897_v46  ;;  %v275_v23 = vmul.f32 %v267_v36, %v926_v60  ;;  %v381_v0 = vrot.slane %v299_v59, %v827_v3 }
  0x66   :  { %v400_v41 = vadd.f32 %v392_v9, %v286_v26  ;;  %v1021_v35 = vmul.f32 %v329_v42, %v910_v52  ;;  %v443_v5 = vrot.slane %v421_v49, %v827_v3  ;;  %v173_v20 = vsub.f32 %v1011_v13, %v169_v56 }
  0x67   :  { %v279_v47 = vsub.f32 %v1017_v61, %v275_v23  ;;  %v495_v6 = vrot.slane %v413_v8, %v827_v3  ;;  %v1147_v50 = vrot.slane %v829_v4, %v825_v2  ;;  %v389_v40 = vmul.f32 %v381_v0, %v940_v7 }
  0x68   :  { %v514_v60 = vadd.f32 %v506_v25, %v400_v41  ;;  %v1034_v22 = vmul.f32 %v443_v5, %v929_v62  ;;  %v194_v59 = vsub.f32 %v845_v16, %v843_v15  ;;  %v308_v8 = vsub.f32 %v866_v28, %v864_v27 }
  0x69   :  { %v140_v30 = vmul.f32 %v1147_v50, %v848_v17  ;;  %v287_v49 = vadd.f32 %v279_v47, %v173_v20  ;;  %v503_v18 = vmul.f32 %v495_v6, %v954_v32  ;;  %v393_v36 = vsub.f32 %v1021_v35, %v389_v40 }
  0x6a   :  { %522 = vst [vmem:[#allocation10 + $0x10] sm:$0xff] %v514_v60  ;;  %v1148_v7 = vrot.slane %v835_v10, %v825_v2  ;;  %v343_v9 = vrot.slane %v861_v24, %v825_v2  ;;  %v422_v15 = vsub.f32 %v884_v39, %v882_v38  ;;  %v89_v27 = vsub.f32 %v895_v45, %v893_v44 }
  0x6b   :  { %v174_v19 = vadd.f32 %v140_v30, %v874_v33  ;;  %v507_v16 = vsub.f32 %v1034_v22, %v503_v18  ;;  %v457_v33 = vrot.slane %v870_v31, %v825_v2  ;;  %v195_v28 = vsub.f32 %v908_v51, %v897_v46 }
  0x6c   :  { %v246_v26 = vmul.f32 %v1148_v7, %v194_v59  ;;  %v401_v32 = vadd.f32 %v393_v36, %v287_v49  ;;  %v360_v25 = vmul.f32 %v343_v9, %v308_v8  ;;  %v233_v38 = vrot.slane %v835_v10, %v827_v3 }
  0x6d   :  { %v474_v39 = vmul.f32 %v457_v33, %v422_v15  ;;  %v1149_v56 = vrot.slane %v829_v4, %v827_v3  ;;  %v309_v44 = vsub.f32 %v912_v53, %v910_v52  ;;  %v347_v45 = vrot.slane %v861_v24, %v827_v3 }
  0x6e   :  { %v280_v42 = vadd.f32 %v246_v26, %v901_v48  ;;  %v515_v46 = vadd.f32 %v507_v16, %v401_v32  ;;  %v394_v41 = vadd.f32 %v360_v25, %v915_v54  ;;  %v247_v48 = vmul.f32 %v233_v38, %v195_v28 }
  0x6f   :  { %v141_v23 = vmul.f32 %v1149_v56, %v89_v27  ;;  %v508_v10 = vadd.f32 %v474_v39, %v935_v1  ;;  %v361_v0 = vmul.f32 %v347_v45, %v309_v44  ;;  %v423_v52 = vsub.f32 %v931_v63, %v929_v62 }
  0x70   :  { %v288_v51 = vadd.f32 %v280_v42, %v174_v19  ;;  %523 = vst [vmem:[#allocation10 + $0x18] sm:$0xff] %v515_v46  ;;  %v281_v53 = vadd.f32 %v247_v48, %v944_v11  ;;  %v461_v54 = vrot.slane %v870_v31, %v827_v3  ;;  %v131_v5 = vrot.slane %v947_v21, %v825_v2 }
  0x71   :  { %v175_v4 = vadd.f32 %v141_v23, %v920_v57  ;;  %v395_v20 = vadd.f32 %v361_v0, %v959_v43  ;;  %v237_v1 = vrot.slane %v956_v34, %v825_v2  ;;  %v351_v57 = vrot.slane %v967_v58, %v825_v2 }
  0x72   :  { %v402_v24 = vadd.f32 %v394_v41, %v288_v51  ;;  %v465_v62 = vrot.slane %v974_v37, %v825_v2 }
  0x73   :  { %670 = shalt.err (!%p667_p8)
}
  0x74   :  { %s671_s20 = scalar_lea.hbm %s1143_s4, 512 }
  0x75   :  { %p672_p9 = scmp.ne.s32.totalorder %s1143_s4, %s671_s20  ;;  %p675_p10 = scmp.lt.u32.totalorder %s671_s20, %s1143_s4 }
  0x77   :  { %p677_p11 = pnand %p675_p10, %p672_p9 }
  0x79   :  { %680 = shalt.err (!%p677_p11)
}
  0x7a   :  { %539 = dma.vmem_to_hbm [thread:$0]  %s1068_s1, 512, %s1143_s4, [#allocation4], %s715_s30, %s715_s30, %s716_s6   ;;  %v516_v2 = vadd.f32 %v508_v10, %v402_v24  ;;  %v289_v31 = vadd.f32 %v281_v53, %v175_v4  ;;  %v475_v63 = vmul.f32 %v461_v54, %v423_v52  ;;  %v142_v11 = vmul.f32 %v131_v5, %v848_v17  ;;  %v1150_v60 = vld [vmem:[#allocation18_spill] sm:$0xff] }
  0x7b   :  { %v248_v43 = vmul.f32 %v237_v1, %v194_v59  ;;  %v362_v47 = vmul.f32 %v351_v57, %v308_v8  ;;  %v476_v6 = vmul.f32 %v465_v62, %v422_v15  ;;  %v135_v50 = vrot.slane %v947_v21, %v827_v3  ;;  %s720_s4 = smov [#allocation11]  }
  0x7c   :  { %524 = vst [vmem:[#allocation11] sm:$0xff] %v516_v2  ;;  %v403_v30 = vadd.f32 %v395_v20, %v289_v31  ;;  %v509_v40 = vadd.f32 %v475_v63, %v1150_v60  ;;  %v176_v49 = vadd.f32 %v142_v11, %v984_v12  ;;  %v241_v18 = vrot.slane %v956_v34, %v827_v3  ;;  %s545_s28 = sshll.u32 %s720_s4, 4  ;;  %s546_s28 = int_to_ptr.vmem [resolvable:$true] %s545_s28 }
  0x7d   :  { %v282_v19 = vadd.f32 %v248_v43, %v989_v55  ;;  %v396_v36 = vadd.f32 %v362_v47, %v999_v14  ;;  %v143_v17 = vmul.f32 %v135_v50, %v89_v27  ;;  %v355_v7 = vrot.slane %v967_v58, %v827_v3  ;;  %s681_s29 = scalar_lea.vmem %s546_s28, 512  ;;  %p686_p13 = scmp.lt.s32.totalorder %s546_s28, %s546_s28 }
  0x7e   :  { %v517_v59 = vadd.f32 %v509_v40, %v403_v30  ;;  %v249_v8 = vmul.f32 %v241_v18, %v195_v28  ;;  %v469_v21 = vrot.slane %v974_v37, %v827_v3  ;;  %v510_v9 = vadd.f32 %v476_v6, %v1004_v29  ;;  %p682_p12 = scmp.ne.s32.totalorder %s546_s28, %s681_s29  ;;  %p687_p0 = scmp.lt.s32.totalorder %s681_s29, %s681_s29 }
  0x7f   :  { %v290_v26 = vadd.f32 %v282_v19, %v176_v49  ;;  %v177_v12 = vadd.f32 %v143_v17, %v1011_v13  ;;  %v363_v55 = vmul.f32 %v355_v7, %v309_v44 }
  0x80   :  { %525 = vst [vmem:[#allocation11 + $0x8] sm:$0xff] %v517_v59  ;;  %v283_v34 = vadd.f32 %v249_v8, %v1017_v61  ;;  %v477_v15 = vmul.f32 %v469_v21, %v423_v52  ;;  %p688_p1 = por %p687_p0, %p686_p13 }
  0x81   :  { %v404_v14 = vadd.f32 %v396_v36, %v290_v26  ;;  %v397_v33 = vadd.f32 %v363_v55, %v1021_v35 }
  0x82   :  { %v291_v16 = vadd.f32 %v283_v34, %v177_v12  ;;  %v511_v27 = vadd.f32 %v477_v15, %v1034_v22  ;;  %p689_p2 = pnand %p688_p1, %p682_p12 }
  0x83   :  { %v518_v58 = vadd.f32 %v510_v9, %v404_v14 }
  0x84   :  { %v405_v3 = vadd.f32 %v397_v33, %v291_v16 }
  0x85   :  { %526 = vst [vmem:[#allocation11 + $0x10] sm:$0xff] %v518_v58 }
  0x86   :  { %v519_v37 = vadd.f32 %v511_v27, %v405_v3 }
  0x88   :  { %527 = vst [vmem:[#allocation11 + $0x18] sm:$0xff] %v519_v37 }
  0x89   :  { %692 = shalt.err (!%p689_p2)
}
  0x8a   :  { %s693_s7 = scalar_lea.hbm %s1144_s5, 512 }
  0x8b   :  { %p694_p3 = scmp.ne.s32.totalorder %s1144_s5, %s693_s7  ;;  %p697_p4 = scmp.lt.u32.totalorder %s693_s7, %s1144_s5 }
  0x8d   :  { %p699_p5 = pnand %p697_p4, %p694_p3 }
  0x8f   :  { %702 = shalt.err (!%p699_p5)
}
  0x90   :  { %551 = dma.vmem_to_hbm [thread:$0]  %s546_s28, 512, %s1144_s5, [#allocation12], %s715_s30, %s715_s30, %s716_s6  }
  0x91   :  { %709 = dma.done.wait [#allocation4], 512  }
  0x92   :  { %710 = vsyncadd [#allocation4], 4294966784 }
  0x93   :  { %711 = dma.done.wait [#allocation12], 512  }
  0x94   :  { %712 = vsyncadd [#allocation12], 4294966784 }
  0x95   :  { %558 = vsyncpa [#allocation3], 1 }
  0x96   :  { %559 = vsyncpa [#allocation6], 1 }
  0x97   :  { %560 = vsyncpa [#allocation9], 1 }
  0x98   :  { %561 = vsyncpa [#allocation4], 1 }
  0x99   :  { %562 = vsyncpa [#allocation12], 1 }

</bundles_post_ra>
